<compile_context>
chip_gen: v7x
topology: tpu7x:2x2x1
jax: 0.10.0
libtpu: 0.0.40
codegen_flags: <defaults>
</compile_context>

<pallas_src>
import jax
import jax.numpy as jnp
from jax.experimental import pallas as pl
from jax.experimental.pallas import tpu as pltpu

LANE = 128
ROW_ALIGN = 16                     # bf16 packs 16 rows per vreg sublane group
VMEM_BUDGET = 40 * 1024 * 1024     # conservative usable budget (v7x: 64 MiB phys)
VMEM_LIMIT = 48 * 1024 * 1024      # explicit scoped-VMEM limit handed to Mosaic
K_TILE_STREAM = 512                # K-block width when W1 streams from HBM
MAX_TILE_M = 512


def _round_up(n, m):
    return ((n + m - 1) // m) * m


def _lane_round(d):
    # 256-lane multiples feed v6e/v7x's 2x256^2 MXU when the dim is large;
    # 128 is already optimal for v5e's 4x128^2 MXU and for small dims.
    return _round_up(d, 256 if d >= 256 else 128)


def _pad2d(a, rows, cols):
    pr, pc = rows - a.shape[0], cols - a.shape[1]
    if pr == 0 and pc == 0:
        return a
    return jnp.pad(a, ((0, pr), (0, pc)))


def _fullmodel_kernel(x_ref, w1_ref, b1_ref, w2_ref, b2_ref, o_ref, acc_ref):
    """Grid = (batch tiles [parallel], K blocks of in_features [arbitrary])."""
    k = pl.program_id(1)

    @pl.when(k == 0)
    def _init():
        acc_ref[...] = jnp.zeros_like(acc_ref)

    # encoder matmul: bf16 on the MXU, f32 accumulation across K blocks.
    acc_ref[...] += jnp.dot(x_ref[...], w1_ref[...],
                            preferred_element_type=jnp.float32)

    @pl.when(k == pl.num_programs(1) - 1)
    def _finalize():
        # bias + ReLU in f32, then classifier matmul (re-quantized to the
        # weight dtype for MXU throughput, f32 accumulate), bias, store.
        h = jnp.maximum(acc_ref[...] + b1_ref[...], 0.0)
        logits = jnp.dot(h.astype(w2_ref.dtype), w2_ref[...],
                         preferred_element_type=jnp.float32)
        o_ref[...] = (logits + b2_ref[...]).astype(o_ref.dtype)


def prepare_params(w1, b1, w2, b2, *, compute_dtype=jnp.bfloat16):
    """Pad + cast the parameters ONCE; reuse the returned tuple across calls.

    Zero padding keeps the math exact: padded x columns hit zero W1 rows,
    padded hidden units are ReLU(0)=0 and hit zero W2 rows, and padded output
    columns / batch rows are sliced off after the kernel.
    """
    F_in, H = w1.shape
    H2, C = w2.shape
    assert H == H2 and b1.shape == (H,) and b2.shape == (C,)

    H_p = _lane_round(H)
    C_p = _lane_round(C)
    bpe = jnp.dtype(compute_dtype).itemsize

    # Constant-index weight blocks are double-buffered by the default pipeline
    # (the DMA is not re-issued, but the allocation is 2x) -> budget 2x.
    resident_bytes = 2 * (F_in * H_p + H_p * C_p) * bpe
    if resident_bytes <= VMEM_BUDGET // 2:
        # Whole W1 stays VMEM-resident: single K step, x's F axis unpadded
        # (block == full array extent waives the 128-lane rule on that axis).
        tile_k = F_in
        F_p = F_in
    else:
        # Large model: stream W1 over the K grid axis in 512-wide blocks.
        tile_k = K_TILE_STREAM
        F_p = _round_up(F_in, tile_k)
    num_k = F_p // tile_k

    w1_bytes = 2 * (F_in if num_k == 1 else tile_k) * H_p * bpe
    w2_bytes = 2 * H_p * C_p * bpe
    bias_bytes = 2 * (H_p + C_p) * 4
    cfg = dict(F_in=F_in, H=H, C=C, F_p=F_p, H_p=H_p, C_p=C_p,
               tile_k=tile_k, num_k=num_k, bpe=bpe,
               weight_bytes=w1_bytes + w2_bytes + bias_bytes,
               compute_dtype=compute_dtype)

    w1p = _pad2d(w1.astype(compute_dtype), F_p, H_p)
    w2p = _pad2d(w2.astype(compute_dtype), H_p, C_p)
    b1p = _pad2d(b1.reshape(1, H).astype(jnp.float32), 1, H_p)
    b2p = _pad2d(b2.reshape(1, C).astype(jnp.float32), 1, C_p)
    return cfg, (w1p, b1p, w2p, b2p)


def _pick_tile_m(B, cfg, out_bpe):
    # Batch tile from the VMEM left after resident weights:
    # 2 x-buffers + 2 out-buffers + 1 f32 accumulator, per batch row.
    per_row = (2 * cfg["tile_k"] * cfg["bpe"]
               + 2 * cfg["C_p"] * out_bpe
               + cfg["H_p"] * 4)
    avail = max(VMEM_BUDGET - cfg["weight_bytes"], per_row * ROW_ALIGN)
    tile_m = min((avail // per_row) // ROW_ALIGN * ROW_ALIGN, MAX_TILE_M)
    tile_m = max(tile_m, ROW_ALIGN)

    b_rows = _round_up(B, ROW_ALIGN)
    tile_m = min(tile_m, b_rows)
    # Keep >=2 batch tiles when the batch allows it so the 'parallel' axis can
    # be sharded across v7x's two TensorCores; on single-TC v5e/v6e the cost is
    # one extra ~0.35us grid step (negligible).
    if tile_m >= b_rows and b_rows >= 2 * ROW_ALIGN:
        tile_m = _round_up((b_rows + 1) // 2, ROW_ALIGN)
    return tile_m


def full_model_forward(x, params, *, out_dtype=jnp.float32):
    """x: [B, in_features] -> logits [B, num_classes]."""
    cfg, (w1p, b1p, w2p, b2p) = params
    B, F_in = x.shape
    assert F_in == cfg["F_in"]
    F_p, H_p, C_p = cfg["F_p"], cfg["H_p"], cfg["C_p"]
    tile_k, num_k = cfg["tile_k"], cfg["num_k"]

    tile_m = _pick_tile_m(B, cfg, jnp.dtype(out_dtype).itemsize)
    B_p = _round_up(B, tile_m)
    grid_m = B_p // tile_m

    # Only per-call work on activations: cast + pad batch rows
    # (F padding only happens in the K-streamed large-model path).
    xp = _pad2d(x.astype(cfg["compute_dtype"]), B_p, F_p)

    def const_spec(shape):
        return pl.BlockSpec(shape, lambda i, k: (0,) * len(shape))

    if num_k == 1:
        w1_spec = const_spec((F_p, H_p))                       # fully resident
    else:
        w1_spec = pl.BlockSpec((tile_k, H_p), lambda i, k: (k, 0))  # streamed

    out_p = pl.pallas_call(
        _fullmodel_kernel,
        out_shape=jax.ShapeDtypeStruct((B_p, C_p), out_dtype),
        grid_spec=pltpu.PrefetchScalarGridSpec(
            num_scalar_prefetch=0,
            grid=(grid_m, num_k),
            in_specs=[
                pl.BlockSpec((tile_m, tile_k), lambda i, k: (i, k)),  # x tile
                w1_spec,                                              # W1
                const_spec((1, H_p)),                                 # b1
                const_spec((H_p, C_p)),                               # W2
                const_spec((1, C_p)),                                 # b2
            ],
            out_specs=pl.BlockSpec((tile_m, C_p), lambda i, k: (i, 0)),
            scratch_shapes=[pltpu.VMEM((tile_m, H_p), jnp.float32)],
        ),
        compiler_params=pltpu.CompilerParams(
            dimension_semantics=("parallel", "arbitrary"),
            vmem_limit_bytes=VMEM_LIMIT,
        ),
    )(xp, w1p, b1p, w2p, b2p)

    return out_p[:B, :cfg["C"]]


def _reference_forward(x, w1, b1, w2, b2):
    h = jnp.maximum(x @ w1 + b1, 0.0)
    return h @ w2 + b2


if __name__ == "__main__":
    # Small deterministic shapes consistent with the module's forward.
    batch, in_features, hidden, num_classes = 16, 32, 64, 16

    key = jax.random.PRNGKey(0)
    kx, kw1, kb1, kw2, kb2 = jax.random.split(key, 5)

    x = jax.random.normal(kx, (batch, in_features), dtype=jnp.float32)
    w1 = jax.random.normal(kw1, (in_features, hidden), dtype=jnp.float32) * 0.1
    b1 = jax.random.normal(kb1, (hidden,), dtype=jnp.float32) * 0.01
    w2 = jax.random.normal(kw2, (hidden, num_classes), dtype=jnp.float32) * 0.1
    b2 = jax.random.normal(kb2, (num_classes,), dtype=jnp.float32) * 0.01

    # Pad/cast the parameters once; reuse across forward calls.
    params = prepare_params(w1, b1, w2, b2)

    out = full_model_forward(x, params)
    out = jax.block_until_ready(out)

    ref = _reference_forward(x, w1, b1, w2, b2)
    assert out.shape == (batch, num_classes)
    # bf16 MXU compute with f32 accumulation -> loosened tolerance vs f32 ref.
    assert jnp.allclose(out, ref, atol=2e-2, rtol=2e-2), (
        float(jnp.max(jnp.abs(out - ref))))

    print("KERNEL_OK")
</pallas_src>

<mosaic_0001>
module attributes {stable_mosaic.version = 11 : i64} {
  func.func @_fullmodel_kernel(%arg0: i32, %arg1: i32, %arg2: memref<16x32xbf16, #tpu.memory_space<vmem>>, %arg3: memref<32x128xbf16, #tpu.memory_space<vmem>>, %arg4: memref<1x128xf32, #tpu.memory_space<vmem>>, %arg5: memref<128x128xbf16, #tpu.memory_space<vmem>>, %arg6: memref<1x128xf32, #tpu.memory_space<vmem>>, %arg7: memref<16x128xf32, #tpu.memory_space<vmem>>, %arg8: memref<16x128xf32, #tpu.memory_space<vmem>>) attributes {dimension_semantics = [#tpu.dimension_semantics<parallel>, #tpu.dimension_semantics<arbitrary>], iteration_bounds = array<i64: 1, 1>, scalar_prefetch = 0 : i64, scratch_operands = 1 : i64, tpu.core_type = #tpu.core_type<tc>, window_params = [{transform_indices = @transform_0, window_bounds = array<i64: 16, 32>}, {pipeline_mode = #tpu.pipeline_mode<synchronous>, transform_indices = @transform_1, window_bounds = array<i64: 32, 128>}, {pipeline_mode = #tpu.pipeline_mode<synchronous>, transform_indices = @transform_2, window_bounds = array<i64: 1, 128>}, {pipeline_mode = #tpu.pipeline_mode<synchronous>, transform_indices = @transform_3, window_bounds = array<i64: 128, 128>}, {pipeline_mode = #tpu.pipeline_mode<synchronous>, transform_indices = @transform_4, window_bounds = array<i64: 1, 128>}, {transform_indices = @transform_5, window_bounds = array<i64: 16, 128>}]} {
    %c0_i32 = arith.constant 0 : i32
    %0 = arith.cmpi eq, %arg1, %c0_i32 : i32
    %1 = arith.extui %0 : i1 to i32
    %c0_i32_0 = arith.constant 0 : i32
    %2 = arith.cmpi ne, %1, %c0_i32_0 : i32
    scf.if %2 {
      %cst_10 = arith.constant 0.000000e+00 : f32
      %12 = vector.broadcast %cst_10 : f32 to vector<16x128xf32>
      %c0_11 = arith.constant 0 : index
      %c0_12 = arith.constant 0 : index
      %13 = vector.load %arg8[%c0_11, %c0_12] : memref<16x128xf32, #tpu.memory_space<vmem>>, vector<16x128xf32>
      tpu.vector_store %arg8[%c0_11, %c0_12], %12 {strides = array<i32>} : memref<16x128xf32, #tpu.memory_space<vmem>>, vector<16x128xf32>,
    } else {
    }
    %c0 = arith.constant 0 : index
    %c0_1 = arith.constant 0 : index
    %3 = vector.load %arg8[%c0, %c0_1] : memref<16x128xf32, #tpu.memory_space<vmem>>, vector<16x128xf32>
    %c0_2 = arith.constant 0 : index
    %c0_3 = arith.constant 0 : index
    %4 = vector.load %arg2[%c0_2, %c0_3] : memref<16x32xbf16, #tpu.memory_space<vmem>>, vector<16x32xbf16>
    %c0_4 = arith.constant 0 : index
    %c0_5 = arith.constant 0 : index
    %5 = vector.load %arg3[%c0_4, %c0_5] : memref<32x128xbf16, #tpu.memory_space<vmem>>, vector<32x128xbf16>
    %cst = arith.constant dense<0.000000e+00> : vector<16x128xf32>
    %6 = tpu.matmul %4, %5, %cst {dimension_numbers = #tpu.dot_dimension_numbers<[1], [0], [0], [1], [0, 0, 1, 1], [], []>} : vector<16x32xbf16>, vector<32x128xbf16>, vector<16x128xf32> -> vector<16x128xf32>
    %7 = arith.addf %3, %6 : vector<16x128xf32>
    %c0_6 = arith.constant 0 : index
    %c0_7 = arith.constant 0 : index
    %8 = vector.load %arg8[%c0_6, %c0_7] : memref<16x128xf32, #tpu.memory_space<vmem>>, vector<16x128xf32>
    tpu.vector_store %arg8[%c0_6, %c0_7], %7 {strides = array<i32>} : memref<16x128xf32, #tpu.memory_space<vmem>>, vector<16x128xf32>,
    %c0_i32_8 = arith.constant 0 : i32
    %9 = arith.cmpi eq, %arg1, %c0_i32_8 : i32
    %10 = arith.extui %9 : i1 to i32
    %c0_i32_9 = arith.constant 0 : i32
    %11 = arith.cmpi ne, %10, %c0_i32_9 : i32
    scf.if %11 {
      %c0_10 = arith.constant 0 : index
      %c0_11 = arith.constant 0 : index
      %12 = vector.load %arg8[%c0_10, %c0_11] : memref<16x128xf32, #tpu.memory_space<vmem>>, vector<16x128xf32>
      %c0_12 = arith.constant 0 : index
      %c0_13 = arith.constant 0 : index
      %13 = vector.load %arg4[%c0_12, %c0_13] : memref<1x128xf32, #tpu.memory_space<vmem>>, vector<1x128xf32>
      %14 = vector.broadcast %13 : vector<1x128xf32> to vector<16x128xf32>
      %15 = arith.addf %12, %14 : vector<16x128xf32>
      %cst_14 = arith.constant 0.000000e+00 : f32
      %16 = vector.broadcast %cst_14 : f32 to vector<16x128xf32>
      %17 = arith.maximumf %15, %16 : vector<16x128xf32>
      %18 = arith.truncf %17 : vector<16x128xf32> to vector<16x128xbf16>
      %c0_15 = arith.constant 0 : index
      %c0_16 = arith.constant 0 : index
      %19 = vector.load %arg5[%c0_15, %c0_16] : memref<128x128xbf16, #tpu.memory_space<vmem>>, vector<128x128xbf16>
      %cst_17 = arith.constant dense<0.000000e+00> : vector<16x128xf32>
      %20 = tpu.matmul %18, %19, %cst_17 {dimension_numbers = #tpu.dot_dimension_numbers<[1], [0], [0], [1], [0, 0, 1, 1], [], []>} : vector<16x128xbf16>, vector<128x128xbf16>, vector<16x128xf32> -> vector<16x128xf32>
      %c0_18 = arith.constant 0 : index
      %c0_19 = arith.constant 0 : index
      %21 = vector.load %arg6[%c0_18, %c0_19] : memref<1x128xf32, #tpu.memory_space<vmem>>, vector<1x128xf32>
      %22 = vector.broadcast %21 : vector<1x128xf32> to vector<16x128xf32>
      %23 = arith.addf %20, %22 : vector<16x128xf32>
      %c0_20 = arith.constant 0 : index
      %c0_21 = arith.constant 0 : index
      %24 = vector.load %arg7[%c0_20, %c0_21] : memref<16x128xf32, #tpu.memory_space<vmem>>, vector<16x128xf32>
      tpu.vector_store %arg7[%c0_20, %c0_21], %23 {strides = array<i32>} : memref<16x128xf32, #tpu.memory_space<vmem>>, vector<16x128xf32>,
    } else {
    }
    return
  }
  func.func @transform_0(%arg0: i32, %arg1: i32) -> (i32, i32) {
    %c0_i32 = arith.constant 0 : i32
    return %arg0, %arg1 : i32, i32
  }
  func.func @transform_1(%arg0: i32, %arg1: i32) -> (i32, i32) {
    %c0_i32 = arith.constant 0 : i32
    %c0_i32_0 = arith.constant 0 : i32
    %c0_i32_1 = arith.constant 0 : i32
    return %c0_i32, %c0_i32_0 : i32, i32
  }
  func.func @transform_2(%arg0: i32, %arg1: i32) -> (i32, i32) {
    %c0_i32 = arith.constant 0 : i32
    %c0_i32_0 = arith.constant 0 : i32
    %c0_i32_1 = arith.constant 0 : i32
    return %c0_i32, %c0_i32_0 : i32, i32
  }
  func.func @transform_3(%arg0: i32, %arg1: i32) -> (i32, i32) {
    %c0_i32 = arith.constant 0 : i32
    %c0_i32_0 = arith.constant 0 : i32
    %c0_i32_1 = arith.constant 0 : i32
    return %c0_i32, %c0_i32_0 : i32, i32
  }
  func.func @transform_4(%arg0: i32, %arg1: i32) -> (i32, i32) {
    %c0_i32 = arith.constant 0 : i32
    %c0_i32_0 = arith.constant 0 : i32
    %c0_i32_1 = arith.constant 0 : i32
    return %c0_i32, %c0_i32_0 : i32, i32
  }
  func.func @transform_5(%arg0: i32, %arg1: i32) -> (i32, i32) {
    %c0_i32 = arith.constant 0 : i32
    %c0_i32_0 = arith.constant 0 : i32
    return %arg0, %c0_i32 : i32, i32
  }
}

</mosaic_0001>

<bundles_post_ra>
// kernel: tpu_custom_call.1
= control target key start
LH: loop header
LB: loop body
LE: loop exit
PB: predicated region body
PF: predicated region fallthrough
CT: control target
= control target key end

     0   :  { %10 = vsyncpa [#allocation4], 0  ;;  %s571_s0 = inlined_call_operand.hbm [shape: bf16[16,32], index: 0, kind: input, shape index: {}]   ;;  %s572_s1 = inlined_call_operand.hbm [shape: bf16[32,128], index: 1, kind: input, shape index: {}]   ;;  %s573_s2 = inlined_call_operand.vmem [shape: f32[1,128], index: 2, kind: input, shape index: {}]   ;;  %s574_s3 = inlined_call_operand.hbm [shape: bf16[128,128], index: 3, kind: input, shape index: {}]   ;;  %s575_s4 = inlined_call_operand.vmem [shape: f32[1,128], index: 4, kind: input, shape index: {}]   ;;  %s576_s5 = inlined_call_operand.hbm [shape: f32[16,128], index: 5, kind: output, shape index: {}]  }
   0x1   :  { %11 = vsyncpa [#allocation7], 0 }
   0x2   :  { %12 = vsyncpa [#allocation5], 0  ;;  %s461_s18 = smov [#allocation6]   ;;  %s462_s20 = smov [#allocation3]  }
   0x3   :  { %s30_s19 = sshll.u32 %s461_s18, 4  ;;  %s18_s21 = sshll.u32 %s462_s20, 4  ;;  %s31_s19 = int_to_ptr.vmem [resolvable:$true] %s30_s19  ;;  %s501_s21 = int_to_ptr.vmem [resolvable:$true] %s18_s21 }
   0x4   :  { %s367_s24 = scalar_lea.hbm %s572_s1, 256 }
   0x5   :  { %p368_p0 = scmp.ne.s32.totalorder %s572_s1, %s367_s24  ;;  %p371_p1 = scmp.lt.u32.totalorder %s367_s24, %s572_s1 }
   0x7   :  { %p373_p2 = pnand %p371_p1, %p368_p0 }
   0x9   :  { %376 = shalt.err (!%p373_p2)
}
   0xa   :  { %s377_s29 = scalar_lea.vmem %s31_s19, 256  ;;  %p382_p4 = scmp.lt.s32.totalorder %s31_s19, %s31_s19 }
   0xb   :  { %p378_p3 = scmp.ne.s32.totalorder %s31_s19, %s377_s29  ;;  %p383_p5 = scmp.lt.s32.totalorder %s377_s29, %s377_s29 }
   0xd   :  { %p384_p6 = por %p383_p5, %p382_p4 }
   0xf   :  { %p385_p7 = pnand %p384_p6, %p378_p3 }
  0x11   :  { %388 = shalt.err (!%p385_p7)
}
  0x12   :  { %s463_s30 = smov 64   ;;  %s464_s6 = smov 4  }
  0x13   :  { %36 = dma.hbm_to_vmem [thread:$0]  %s572_s1, 256, %s31_s19, [#allocation7], %s463_s30, %s463_s30, %s464_s6  }
  0x14   :  { %s389_s11 = scalar_lea.hbm %s571_s0, 128 }
  0x15   :  { %p390_p8 = scmp.ne.s32.totalorder %s571_s0, %s389_s11  ;;  %p393_p9 = scmp.lt.u32.totalorder %s389_s11, %s571_s0 }
  0x17   :  { %p395_p10 = pnand %p393_p9, %p390_p8 }
  0x19   :  { %398 = shalt.err (!%p395_p10)
}
  0x1a   :  { %s399_s16 = scalar_lea.vmem %s501_s21, 128  ;;  %p404_p12 = scmp.lt.s32.totalorder %s501_s21, %s501_s21 }
  0x1b   :  { %p400_p11 = scmp.ne.s32.totalorder %s501_s21, %s399_s16  ;;  %p405_p13 = scmp.lt.s32.totalorder %s399_s16, %s399_s16 }
  0x1d   :  { %p406_p0 = por %p405_p13, %p404_p12 }
  0x1f   :  { %p407_p1 = pnand %p406_p0, %p400_p11 }
  0x21   :  { %410 = shalt.err (!%p407_p1)
}
  0x22   :  { %24 = dma.hbm_to_vmem [thread:$0]  %s571_s0, 128, %s501_s21, [#allocation4], %s463_s30, %s463_s30, %s464_s6  }
  0x23   :  { %s465_s18 = smov [#allocation8]   ;;  %s411_s23 = scalar_lea.hbm %s574_s3, 1024 }
  0x24   :  { %s44_s19 = sshll.u32 %s465_s18, 4  ;;  %p412_p2 = scmp.ne.s32.totalorder %s574_s3, %s411_s23  ;;  %s45_s19 = int_to_ptr.vmem [resolvable:$true] %s44_s19 }
  0x25   :  { %p415_p3 = scmp.lt.u32.totalorder %s411_s23, %s574_s3 }
  0x27   :  { %p417_p4 = pnand %p415_p3, %p412_p2 }
  0x29   :  { %420 = shalt.err (!%p417_p4)
}
  0x2a   :  { %s421_s28 = scalar_lea.vmem %s45_s19, 1024  ;;  %p426_p6 = scmp.lt.s32.totalorder %s45_s19, %s45_s19 }
  0x2b   :  { %p422_p5 = scmp.ne.s32.totalorder %s45_s19, %s421_s28  ;;  %p427_p7 = scmp.lt.s32.totalorder %s421_s28, %s421_s28 }
  0x2d   :  { %p428_p8 = por %p427_p7, %p426_p6 }
  0x2f   :  { %p429_p9 = pnand %p428_p8, %p422_p5 }
  0x31   :  { %432 = shalt.err (!%p429_p9)
}
  0x32   :  { %50 = dma.hbm_to_vmem [thread:$0]  %s574_s3, 1024, %s45_s19, [#allocation7], %s463_s30, %s463_s30, %s464_s6  }
  0x33   :  { %455 = dma.done.wait [#allocation4], 128  }
  0x34   :  { %456 = vsyncadd [#allocation4], 4294967168 }
  0x35   :  { %457 = dma.done.wait [#allocation7], 1280  }
  0x36   :  { %458 = vsyncadd [#allocation7], 4294966016  ;;  %v466_v0 = vmov 0.0   ;;  %vm467_vm0 = vmmov 0   ;;  %v356_v1 = vld [vmem:[#allocation6] sm:$0xff]   ;;  %v357_v2 = vld [vmem:[#allocation6 + $0x8] sm:$0xff]  }
  0x37   :  { %318 = vmatprep.subr.bf16.mxu0 %v466_v0  ;;  %322 = vmatprep.mubr.msk.bf16.mxu0 %vm467_vm0, %v466_v0  ;;  %v359_v3 = vld [vmem:[#allocation8] sm:$0xff]   ;;  %v358_v4 = vld [vmem:[#allocation3] sm:$0xff]   ;;  %vm94_vm1 = vcmask 261120   ;;  %v361_v6 = vld [vmem:[#allocation8 + $0x10] sm:$0xff]   ;;  %s468_s7 = smov [#allocation9]  }
  0x38   :  { %326 = vmatprep.subr.bf16.mxu1 %v466_v0  ;;  %342 = vmatprep.mubr.msk.bf16.mxu1 %vm467_vm0, %v466_v0  ;;  %v360_v5 = vld [vmem:[#allocation8 + $0x8] sm:$0xff]   ;;  %v362_v7 = vld [vmem:[#allocation8 + $0x18] sm:$0xff]   ;;  %v363_v8 = vld [vmem:[#allocation8 + $0x20] sm:$0xff]   ;;  %s279_s8 = sshll.u32 %s468_s7, 4  ;;  %s280_s8 = int_to_ptr.vmem [resolvable:$true] %s279_s8 }
  0x39   :  { %319 = vmatpush3.bf16.msra.mxu0 %v356_v1  ;;  %327 = vmatpush3.bf16.msra.mxu1 %v359_v3  ;;  %v364_v9 = vld [vmem:[#allocation8 + $0x28] sm:$0xff]   ;;  %v365_v10 = vld [vmem:[#allocation8 + $0x30] sm:$0xff]   ;;  %v366_v11 = vld [vmem:[#allocation8 + $0x38] sm:$0xff]   ;;  %p438_p11 = scmp.lt.s32.totalorder %s280_s8, %s280_s8 }
  0x3a   :  { %320 = vmatprep.subr.bf16.mxu0 %v466_v0  ;;  %328 = vmatprep.subr.bf16.mxu1 %v466_v0  ;;  %v296_v12 = vld [vmem:[%s573_s2] ss:$0 sm:$0xff]  ;;  %s433_s2 = scalar_lea.vmem %s280_s8, 256 }
  0x3b   :  { %v297_v22 = vld [vmem:[%s575_s4] ss:$0 sm:$0xff]  ;;  %p434_p10 = scmp.ne.s32.totalorder %s280_s8, %s433_s2  ;;  %p439_p12 = scmp.lt.s32.totalorder %s433_s2, %s433_s2 }
  0x3d   :  { %321 = vmatpush3.bf16.msra.mxu0 %v357_v2  ;;  %329 = vmatpush3.bf16.msra.mxu1 %v360_v5  ;;  %p440_p13 = por %p439_p12, %p438_p11 }
  0x3e   :  { %330 = vmatprep.subr.bf16.mxu1 %v466_v0 }
  0x3f   :  { %p441_p0 = pnand %p440_p13, %p434_p10 }
  0x40   :  { %323 = vmatmul.mubr.msk.bf16.vlgmr.msra.gmra.mrb[0].mxu0 %vm94_vm1, %v358_v4 }
  0x41   :  { %331 = vmatpush3.bf16.msra.mxu1 %v361_v6 }
  0x42   :  { %332 = vmatprep.subr.bf16.mxu1 %v466_v0 }
  0x45   :  { %333 = vmatpush3.bf16.msra.mxu1 %v362_v7 }
  0x46   :  { %334 = vmatprep.subr.bf16.mxu1 %v466_v0 }
  0x49   :  { %335 = vmatpush3.bf16.msra.mxu1 %v363_v8 }
  0x4a   :  { %336 = vmatprep.subr.bf16.mxu1 %v466_v0 }
  0x4d   :  { %337 = vmatpush3.bf16.msra.mxu1 %v364_v9 }
  0x4e   :  { %338 = vmatprep.subr.bf16.mxu1 %v466_v0 }
  0x51   :  { %339 = vmatpush3.bf16.msra.mxu1 %v365_v10 }
  0x52   :  { %340 = vmatprep.subr.bf16.mxu1 %v466_v0 }
  0x55   :  { %341 = vmatpush3.bf16.msra.mxu1 %v366_v11 }
 0x113   :  { %v132_v13 = vpop.f32.mrb[0].mxu0 }
 0x114   :  { %v155_v14 = vadd.f32 %v296_v12, %v132_v13  ;;  %v324_v15 = vpop.f32.mrb[1].mxu0 }
 0x115   :  { %v135_v16 = vpop.f32.mrb[2].mxu0 }
 0x116   :  { %v156_v17 = vadd.f32 %v296_v12, %v135_v16  ;;  %v325_v18 = vpop.f32.mrb[3].mxu0  ;;  %v157_v19 = vmax.f32 %v155_v14, 0.0 }
 0x118   :  { %v158_v20 = vmax.f32 %v156_v17, 0.0 }
 0x11a   :  { %v159_v21 = vpack.c.bf16 %v158_v20, %v157_v19 }
 0x11c   :  { %343 = vmatmul.mubr.bf16.vlgmr.msra.gmra.mrb[0].mxu1 %v159_v21 }
 0x1ef   :  { %v265_v23 = vpop.f32.mrb[0].mxu1 }
 0x1f0   :  { %v266_v24 = vadd.f32 %v297_v22, %v265_v23  ;;  %v344_v25 = vpop.f32.mrb[1].mxu1 }
 0x1f1   :  { %v268_v26 = vpop.f32.mrb[2].mxu1 }
 0x1f2   :  { %272 = vst [vmem:[#allocation9] sm:$0xff] %v266_v24  ;;  %v269_v27 = vadd.f32 %v297_v22, %v268_v26  ;;  %v345_v28 = vpop.f32.mrb[3].mxu1 }
 0x1f4   :  { %273 = vst [vmem:[#allocation9 + $0x8] sm:$0xff] %v269_v27 }
 0x1f5   :  { %444 = shalt.err (!%p441_p0)
}
 0x1f6   :  { %s445_s10 = scalar_lea.hbm %s576_s5, 256 }
 0x1f7   :  { %p446_p1 = scmp.ne.s32.totalorder %s576_s5, %s445_s10  ;;  %p449_p2 = scmp.lt.u32.totalorder %s445_s10, %s576_s5 }
 0x1f9   :  { %p451_p3 = pnand %p449_p2, %p446_p1 }
 0x1fb   :  { %454 = shalt.err (!%p451_p3)
}
 0x1fc   :  { %s469_s15 = smov 128   ;;  %s470_s16 = smov 8  }
 0x1fd   :  { %285 = dma.vmem_to_hbm [thread:$0]  %s280_s8, 256, %s576_s5, [#allocation5], %s469_s15, %s469_s15, %s470_s16  }
 0x1fe   :  { %459 = dma.done.wait [#allocation5], 256  }
 0x1ff   :  { %460 = vsyncadd [#allocation5], 4294967040 }
 0x200   :  { %289 = vsyncpa [#allocation4], 1 }
 0x201   :  { %290 = vsyncpa [#allocation7], 1 }
 0x202   :  { %291 = vsyncpa [#allocation5], 1 }

</bundles_post_ra>
